<compile_context>
chip_gen: v6e
topology: v6e:2x2x1
jax: 0.10.0
libtpu: 0.0.40
codegen_flags: <defaults>
</compile_context>

<pallas_src>
import jax
import jax.numpy as jnp
from jax.experimental import pallas as pl
from jax.experimental.pallas import tpu as pltpu


_LANE_CAP = 16384          # max trailing-dim width for the 2-D reflatten
_MAX_DMA_CHUNKS = 4        # keep a few large DMAs in flight


def _sublane_multiple(dtype) -> int:
    itemsize = jnp.dtype(dtype).itemsize
    return {4: 8, 2: 16, 1: 32}.get(itemsize, 8)


def _pick_layout(total: int):
    """Pick a lane-friendly (rows, cols) flattening of `total` elements."""
    # Preferred: largest divisor of `total` that is a multiple of 128 and
    # <= _LANE_CAP (lane-dense trailing dim).
    if total % 128 == 0:
        m = total // 128
        for d in range(min(m, _LANE_CAP // 128), 0, -1):
            if m % d == 0:
                cols = 128 * d
                return total // cols, cols
    # Fallback (total not a multiple of 128): largest divisor of `total`
    # that fits in _LANE_CAP — avoids degenerate tiny trailing dims.
    best = 1
    d = 1
    while d * d <= total:
        if total % d == 0:
            if d <= _LANE_CAP and d > best:
                best = d
            q = total // d
            if q <= _LANE_CAP and q > best:
                best = q
        d += 1
    cols = best
    return total // cols, cols


def _chunk_bounds(rows: int, sublane: int, target_chunks: int = _MAX_DMA_CHUNKS):
    """Split `rows` into up to `target_chunks` sublane-aligned (start, size) spans."""
    if rows >= sublane:
        n = max(1, min(target_chunks, rows // sublane))
    else:
        n = 1
    base = -(-rows // n)                       # ceil(rows / n)
    base = -(-base // sublane) * sublane       # round up to sublane multiple
    bounds = []
    start = 0
    while start < rows:
        size = min(base, rows - start)
        bounds.append((start, size))
        start += size
    return bounds


def _make_dma_identity_kernel(chunk_bounds):
    """Kernel: raw HBM->HBM copy via overlapped async DMAs (no VMEM staging)."""

    def kernel(x_hbm, o_hbm, sem):
        copies = []
        # Issue every chunk's DMA first so they overlap on the DMA engines...
        for i, (start, size) in enumerate(chunk_bounds):
            cp = pltpu.make_async_copy(
                x_hbm.at[pl.ds(start, size), :],
                o_hbm.at[pl.ds(start, size), :],
                sem.at[i],
            )
            cp.start()
            copies.append(cp)
        # ...then wait for all of them.
        for cp in copies:
            cp.wait()

    return kernel


def _identity_copy(x):
    """Materialized identity copy: direct HBM->HBM DMA through a Pallas kernel."""
    # Degenerate shapes: nothing to DMA.
    if x.ndim == 0 or x.size == 0:
        return x

    orig_shape = x.shape
    total = int(x.size)
    dtype_size = jnp.dtype(x.dtype).itemsize

    rows, cols = _pick_layout(total)
    x2 = x.reshape(rows, cols)

    sublane = _sublane_multiple(x.dtype)
    bounds = _chunk_bounds(rows, sublane)
    n_chunks = len(bounds)

    out2 = pl.pallas_call(
        _make_dma_identity_kernel(bounds),
        out_shape=jax.ShapeDtypeStruct((rows, cols), x.dtype),
        in_specs=[pl.BlockSpec(memory_space=pl.ANY)],   # stay in HBM, no auto-DMA
        out_specs=pl.BlockSpec(memory_space=pl.ANY),    # written directly by DMA
        scratch_shapes=[pltpu.SemaphoreType.DMA((n_chunks,))],
        cost_estimate=pl.CostEstimate(
            flops=0,
            transcendentals=0,
            bytes_accessed=2 * total * dtype_size,
        ),
    )(x2)

    return out2.reshape(orig_shape)


def identity(x, materialize: bool = False):
    """nn.Identity forward.

    Default: the optimal implementation — return x unchanged (no kernel, no
    HBM traffic).  This is also the right behavior when the caller donates x
    under jit (a materialized copy would only rewrite identical bytes).
    Set materialize=True to force a fresh HBM buffer via the DMA-copy kernel.
    """
    if not materialize:
        return x
    return _identity_copy(x)


if __name__ == "__main__":
    key = jax.random.PRNGKey(0)
    k0, k1, k2 = jax.random.split(key, 3)

    # Small NCHW input consistent with the module's expected usage.
    x = jax.random.normal(k0, (2, 4, 16, 16), dtype=jnp.float32)

    # True Identity semantics: zero-cost pass-through (no kernel launch).
    y0 = identity(x)
    assert y0 is x

    # Materialized copy path: single HBM->HBM DMA.
    y = identity(x, materialize=True)
    jax.block_until_ready(y)
    assert y.shape == x.shape and y.dtype == x.dtype
    assert bool(jnp.array_equal(y, x))

    # Larger input: exercises the multi-chunk (overlapped DMA) path.
    xb = jax.random.normal(k1, (64, 64, 128), dtype=jnp.float32)
    yb = identity(xb, materialize=True)
    jax.block_until_ready(yb)
    assert yb.shape == xb.shape and yb.dtype == xb.dtype
    assert bool(jnp.array_equal(yb, xb))

    # Odd (non-multiple-of-128) shape: exercises the divisor fallback layout.
    xc = jax.random.normal(k2, (2, 3, 7), dtype=jnp.float32)
    yc = identity(xc, materialize=True)
    jax.block_until_ready(yc)
    assert yc.shape == xc.shape and yc.dtype == xc.dtype
    assert bool(jnp.array_equal(yc, xc))

    print("KERNEL_OK")
</pallas_src>

<mosaic_0001>
module attributes {stable_mosaic.version = 11 : i64} {
  func.func @kernel(%arg0: memref<1x2048xf32, #tpu.memory_space<any>>, %arg1: memref<1x2048xf32, #tpu.memory_space<any>>, %arg2: memref<1x!tpu.dma_semaphore, #tpu.memory_space<semaphore_mem>>) attributes {dimension_semantics = [], scalar_prefetch = 0 : i64, scratch_operands = 1 : i64, tpu.core_type = #tpu.core_type<tc>} {
    %c0_i32 = arith.constant 0 : i32
    %c0_i32_0 = arith.constant 0 : i32
    %c0_i32_1 = arith.constant 0 : i32
    %0 = tpu.memref_slice %arg0[%c0_i32_0, %c0_i32_1] : memref<1x2048xf32, #tpu.memory_space<any>> -> memref<1x2048xf32, #tpu.memory_space<any>>
    %c0_i32_2 = arith.constant 0 : i32
    %c0_i32_3 = arith.constant 0 : i32
    %1 = tpu.memref_slice %arg1[%c0_i32_2, %c0_i32_3] : memref<1x2048xf32, #tpu.memory_space<any>> -> memref<1x2048xf32, #tpu.memory_space<any>>
    %2 = tpu.memref_slice %arg2[%c0_i32] : memref<1x!tpu.dma_semaphore, #tpu.memory_space<semaphore_mem>> -> memref<1x!tpu.dma_semaphore, #tpu.memory_space<semaphore_mem>>
    %3 = tpu.memref_squeeze %2 : memref<1x!tpu.dma_semaphore, #tpu.memory_space<semaphore_mem>> -> memref<!tpu.dma_semaphore, #tpu.memory_space<semaphore_mem>>
    tpu.enqueue_dma source(%0 : memref<1x2048xf32, #tpu.memory_space<any>>) target(%1 : memref<1x2048xf32, #tpu.memory_space<any>>) target_semaphore(%3 : memref<!tpu.dma_semaphore, #tpu.memory_space<semaphore_mem>>)
    %c0_i32_4 = arith.constant 0 : i32
    %c0_i32_5 = arith.constant 0 : i32
    %c0_i32_6 = arith.constant 0 : i32
    %4 = tpu.memref_slice %arg0[%c0_i32_5, %c0_i32_6] : memref<1x2048xf32, #tpu.memory_space<any>> -> memref<1x2048xf32, #tpu.memory_space<any>>
    %c0_i32_7 = arith.constant 0 : i32
    %c0_i32_8 = arith.constant 0 : i32
    %5 = tpu.memref_slice %arg1[%c0_i32_7, %c0_i32_8] : memref<1x2048xf32, #tpu.memory_space<any>> -> memref<1x2048xf32, #tpu.memory_space<any>>
    %6 = tpu.memref_slice %arg2[%c0_i32_4] : memref<1x!tpu.dma_semaphore, #tpu.memory_space<semaphore_mem>> -> memref<1x!tpu.dma_semaphore, #tpu.memory_space<semaphore_mem>>
    %7 = tpu.memref_squeeze %6 : memref<1x!tpu.dma_semaphore, #tpu.memory_space<semaphore_mem>> -> memref<!tpu.dma_semaphore, #tpu.memory_space<semaphore_mem>>
    tpu.wait_dma2 semaphore(%7 : memref<!tpu.dma_semaphore, #tpu.memory_space<semaphore_mem>>) src(%4 : memref<1x2048xf32, #tpu.memory_space<any>>) dst(%5 : memref<1x2048xf32, #tpu.memory_space<any>>)
    return
  }
}

</mosaic_0001>

<bundles_post_ra>
// kernel: tpu_custom_call.1
= control target key start
LH: loop header
LB: loop body
LE: loop exit
PB: predicated region body
PF: predicated region fallthrough
CT: control target
= control target key end

     0   :  { %s28_s6 = smov [#allocation2]   ;;  %s29_s7 = smov 131072   ;;  %s47_s0 = inlined_call_operand.hbm [shape: f32[1,2048], index: 0, kind: input, shape index: {}]   ;;  %s48_s1 = inlined_call_operand.hbm [shape: f32[1,2048], index: 1, kind: output, shape index: {}]  }
   0x1   :  { %s30_s8 = smov 0  }
   0x2   :  { %12 = dma.general %s47_s0, 256, %s48_s1, %s28_s6, %s29_s7, [#allocation4], %s30_s8, 0  }
   0x3   :  { %26 = dma.done.wait [#allocation2], 256 }
   0x4   :  { %27 = vsyncadd [#allocation2], 4294967040 }
   0x5   :  { %16 = vsyncmov [#allocation2] }
   0x8   :  { %s17_s13 = vpop.sfrf %16 }
   0x9   :  { %p22_p0 = scmp.ne.s32.totalorder %s17_s13, 0 }
   0xb   :  { %21 = shalt.err (%p22_p0)  }

</bundles_post_ra>
